<compile_context>
chip_gen: v5e
topology: v5e:2x2
jax: 0.10.0
libtpu: 0.0.40
codegen_flags: <defaults>
</compile_context>

<pallas_src>
import functools

import jax
import jax.numpy as jnp
from jax import lax
from jax.experimental import pallas as pl
from jax.experimental.pallas import tpu as pltpu


# ---------------------------------------------------------------------------
# Kernels
# ---------------------------------------------------------------------------
def _fused_kernel(x_ref, w_ref, bprime_ref, xhat_ref, *, precision):
    # x_ref:      (tN, gd)   tokens, one head-group's lanes
    # w_ref:      (gd, gd)   block-diag per-head E_h @ D_h for this group
    # bprime_ref: (1,  gd)   bias - bias @ W   (float32)
    # xhat_ref:   (tN, gd)
    x = x_ref[...]
    xh = jnp.dot(x.astype(w_ref.dtype), w_ref[...],
                 preferred_element_type=jnp.float32, precision=precision)
    xh = xh + bprime_ref[...].astype(jnp.float32)
    xhat_ref[...] = xh.astype(xhat_ref.dtype)


def _encode_decode_kernel(x_ref, bias_ref, e_ref, d_ref, xhat_ref, f_ref, *,
                          precision):
    # x_ref: (tN, gd); bias_ref: (1, gd); e_ref: (gd, gX); d_ref: (gX, gd)
    xc = x_ref[...].astype(jnp.float32) - bias_ref[...].astype(jnp.float32)
    f = jnp.dot(xc.astype(e_ref.dtype), e_ref[...],
                preferred_element_type=jnp.float32, precision=precision)
    xh = jnp.dot(f.astype(d_ref.dtype), d_ref[...],
                 preferred_element_type=jnp.float32, precision=precision)
    xh = xh + bias_ref[...].astype(jnp.float32)
    f_ref[...] = f.astype(f_ref.dtype)
    xhat_ref[...] = xh.astype(xhat_ref.dtype)


# ---------------------------------------------------------------------------
# One-time parameter packing (hoisted out of the per-call path)
# ---------------------------------------------------------------------------
def _divisors(n):
    return [i for i in range(1, n + 1) if n % i == 0]


def _choose_heads_per_group(h, d, X, max_group_lanes):
    """Pick heads-per-group so fused lane widths are 128-aligned and bounded."""
    # Single group (full-extent lanes) is always layout-legal.
    if h * d <= max_group_lanes and h * X <= max_group_lanes:
        return h
    legal = [hg for hg in _divisors(h)
             if hg < h and (hg * d) % 128 == 0 and (hg * X) % 128 == 0]
    fitting = [hg for hg in legal
               if hg * d <= max_group_lanes and hg * X <= max_group_lanes]
    if fitting:
        return max(fitting)
    if legal:
        return min(legal)
    return h  # fall back to one big group (still correct)


def prepare_linear_head_dict_params(bias, E, D, *, compute_dtype=None,
                                    max_group_lanes=512):
    """Pack E/D/bias into head-group block-diagonal weights. Call once."""
    h, d, X = E.shape
    if D.shape != (h, X, d):
        raise ValueError(f"D must be (h, X, d)=({h},{X},{d}); got {D.shape}")
    if bias.shape != (h, d):
        raise ValueError(f"bias must be (h, d)=({h},{d}); got {bias.shape}")
    if compute_dtype is None:
        compute_dtype = E.dtype
    compute_dtype = jnp.dtype(compute_dtype)

    hg = _choose_heads_per_group(h, d, X, max_group_lanes)
    G = h // hg
    gd, gX = hg * d, hg * X

    f32 = jnp.float32
    E32, D32, b32 = E.astype(f32), D.astype(f32), bias.astype(f32)
    eye = jnp.eye(hg, dtype=f32)

    # Encode/decode block-diagonal weights per head group.
    E_bd = jnp.einsum("jk,gjdx->gjdkx", eye,
                      E32.reshape(G, hg, d, X)).reshape(G, gd, gX)
    D_bd = jnp.einsum("jk,gjxd->gjxkd", eye,
                      D32.reshape(G, hg, X, d)).reshape(G, gX, gd)

    # Fused no-features weights:  x_hat = x @ W + (b - b @ W)
    W = jnp.einsum("hdx,hxe->hde", E32, D32)                      # (h, d, d)
    W_bd = jnp.einsum("jk,gjde->gjdke", eye,
                      W.reshape(G, hg, d, d)).reshape(G, gd, gd)
    bprime = (b32 - jnp.einsum("hd,hde->he", b32, W)).reshape(1, h * d)

    return dict(
        h=h, d=d, X=X, G=G, hg=hg, gd=gd, gX=gX,
        compute_dtype=compute_dtype,
        bias_flat=b32.reshape(1, h * d),       # float32 for exact bias add
        bprime=bprime,                         # float32
        E_bd=E_bd.astype(compute_dtype),
        D_bd=D_bd.astype(compute_dtype),
        W_bd=W_bd.astype(compute_dtype),
    )


# ---------------------------------------------------------------------------
# Forward wrapper
# ---------------------------------------------------------------------------
def linear_head_dict_forward(x, params, *, output_features=False, tile_n=None,
                             vmem_budget_bytes=20 * 1024 * 1024,
                             interpret=False):
    """x: (b, s, h, d) -> x_hat (b, s, h, d) [and f (b, s, h, X) if requested]."""
    h, d, X = params["h"], params["d"], params["X"]
    G, gd, gX = params["G"], params["gd"], params["gX"]
    cdt = params["compute_dtype"]

    b, s, hh, dd = x.shape
    if (hh, dd) != (h, d):
        raise ValueError(f"x trailing dims {(hh, dd)} != (h, d)={(h, d)}")

    N = b * s
    HD, HX = h * d, h * X
    out_dtype = x.dtype
    x_flat = x.reshape(N, HD)                      # free contiguous reshape

    precision = lax.Precision.HIGHEST if cdt == jnp.float32 else None

    # ---- token-tile size from a VMEM budget (double-buffered streams) ----
    xb = jnp.dtype(x.dtype).itemsize
    ob = jnp.dtype(out_dtype).itemsize
    wb = cdt.itemsize
    if output_features:
        weight_bytes = (gd * gX + gX * gd) * wb
        row_bytes = gd * xb + (gd + gX) * ob
    else:
        weight_bytes = gd * gd * wb
        row_bytes = gd * xb + gd * ob
    fixed_bytes = 2 * weight_bytes + 2 * 8 * max(HD, 128) * 4   # weights + bias bufs
    budget = max(vmem_budget_bytes - fixed_bytes, 1 << 20)
    derived_tn = max(8, budget // (2 * row_bytes))

    if N <= 8:
        tN = N                                     # full extent (always legal)
    else:
        cand = derived_tn if tile_n is None else min(int(tile_n), derived_tn)
        tN = int(min(cand, N, 4096))
        if G == 1 and N >= 16:                     # keep >=2 grid steps (v7x: 2 TCs)
            half = -(-(-(-N // 2)) // 8) * 8       # ceil(N/2) rounded up to 8
            tN = min(tN, half)
        tN = max(8, (tN // 8) * 8)                 # sublane-aligned

    n_tiles = pl.cdiv(N, tN)
    grid = (G, n_tiles)

    # Scoped-VMEM limit matching the chosen tile (stays well under v7x 64 MiB).
    est = 2 * weight_bytes + 2 * tN * row_bytes + 4 * 8 * max(HD, 128) + (2 << 20)
    vmem_limit = int(min(max(2 * est, 32 << 20), 56 << 20))

    # Advisory cost estimate (memory-bound kernel).
    if output_features:
        flops = 4 * N * G * gd * gX
        bytes_accessed = (N * HD * xb + N * HD * ob + N * HX * ob
                          + G * weight_bytes + HD * 4)
    else:
        flops = 2 * N * G * gd * gd
        bytes_accessed = (N * HD * xb + N * HD * ob
                          + G * weight_bytes + HD * 4)
    cost = pl.CostEstimate(flops=int(flops), transcendentals=0,
                           bytes_accessed=int(bytes_accessed))

    xhat_spec = pl.BlockSpec((tN, gd), lambda g, n: (n, g))

    if output_features:
        kernel = functools.partial(_encode_decode_kernel, precision=precision)
        in_specs = [
            pl.BlockSpec((tN, gd), lambda g, n: (n, g)),        # x (streamed)
            pl.BlockSpec((1, gd), lambda g, n: (0, g)),         # bias (per group)
            pl.BlockSpec((None, gd, gX), lambda g, n: (g, 0, 0)),  # E_bd
            pl.BlockSpec((None, gX, gd), lambda g, n: (g, 0, 0)),  # D_bd
        ]
        out_shape = (jax.ShapeDtypeStruct((N, HD), out_dtype),
                     jax.ShapeDtypeStruct((N, HX), out_dtype))
        out_specs = (xhat_spec, pl.BlockSpec((tN, gX), lambda g, n: (n, g)))
        args = (x_flat, params["bias_flat"], params["E_bd"], params["D_bd"])
    else:
        kernel = functools.partial(_fused_kernel, precision=precision)
        in_specs = [
            pl.BlockSpec((tN, gd), lambda g, n: (n, g)),        # x (streamed)
            pl.BlockSpec((None, gd, gd), lambda g, n: (g, 0, 0)),  # W_bd
            pl.BlockSpec((1, gd), lambda g, n: (0, g)),         # b'
        ]
        out_shape = jax.ShapeDtypeStruct((N, HD), out_dtype)
        out_specs = xhat_spec
        args = (x_flat, params["W_bd"], params["bprime"])

    result = pl.pallas_call(
        kernel,
        out_shape=out_shape,
        grid_spec=pltpu.PrefetchScalarGridSpec(
            num_scalar_prefetch=0,
            grid=grid,
            in_specs=in_specs,
            out_specs=out_specs,
        ),
        compiler_params=pltpu.CompilerParams(
            dimension_semantics=("parallel", "parallel"),
            vmem_limit_bytes=vmem_limit,
        ),
        cost_estimate=cost,
        interpret=interpret,
    )(*args)

    if output_features:
        xhat_flat, f_flat = result
        return xhat_flat.reshape(b, s, h, d), f_flat.reshape(b, s, h, X)
    return result.reshape(b, s, h, d)


# ---------------------------------------------------------------------------
# Pure-JAX reference (mirrors the PyTorch einsums exactly)
# ---------------------------------------------------------------------------
def reference_forward(x, bias, E, D):
    f = jnp.einsum("bshd,hdx->bshx", x - bias, E,
                   precision=lax.Precision.HIGHEST)
    x_hat = jnp.einsum("bshx,hxd->bshd", f, D,
                       precision=lax.Precision.HIGHEST) + bias
    return x_hat, f


if __name__ == "__main__":
    # Small shapes consistent with hook_z-style activations.
    batch, seq, n_head, d_head = 2, 8, 4, 32
    dict_size = d_head  # default in LinearHeadDict.__init__

    key = jax.random.PRNGKey(0)
    k_x, k_e, k_b, k_x2 = jax.random.split(key, 4)

    # E as consumed by the encode einsum: (h, d, X); D = per-head E^T: (h, X, d).
    E = jax.random.normal(k_e, (n_head, d_head, dict_size), dtype=jnp.float32)
    D = jnp.transpose(E, (0, 2, 1))
    bias = 0.1 * jax.random.normal(k_b, (n_head, d_head), dtype=jnp.float32)
    x = jax.random.normal(k_x, (batch, seq, n_head, d_head), dtype=jnp.float32)

    # Pack weights once (f32 compute -> precision=HIGHEST inside the kernel).
    params = prepare_linear_head_dict_params(bias, E, D)

    # Path 1: features path (encode + decode matmuls per step).
    x_hat, f = linear_head_dict_forward(x, params, output_features=True)
    x_hat, f = jax.block_until_ready((x_hat, f))
    x_hat_ref, f_ref = reference_forward(x, bias, E, D)
    assert x_hat.shape == (batch, seq, n_head, d_head)
    assert f.shape == (batch, seq, n_head, dict_size)
    assert jnp.allclose(x_hat, x_hat_ref, atol=1e-4, rtol=1e-4)
    assert jnp.allclose(f, f_ref, atol=1e-4, rtol=1e-4)

    # Path 2: fused no-features fast path (single x @ W + b' matmul), with a
    # non-divisible token count so the masked final tile is exercised.
    b2, s2 = 3, 37  # N = 111, not a multiple of the tile
    x2 = jax.random.normal(k_x2, (b2, s2, n_head, d_head), dtype=jnp.float32)
    x_hat2 = linear_head_dict_forward(x2, params, output_features=False, tile_n=64)
    x_hat2 = jax.block_until_ready(x_hat2)
    x_hat2_ref, _ = reference_forward(x2, bias, E, D)
    assert x_hat2.shape == (b2, s2, n_head, d_head)
    assert jnp.allclose(x_hat2, x_hat2_ref, atol=1e-3, rtol=1e-3)

    # Path 3: bf16 compute dtype (single-pass MXU); sanity-check only since
    # bf16 weights deliberately trade accuracy for throughput.
    params_bf16 = prepare_linear_head_dict_params(bias, E, D,
                                                  compute_dtype=jnp.bfloat16)
    x_hat3 = linear_head_dict_forward(x2, params_bf16, output_features=False)
    x_hat3 = jax.block_until_ready(x_hat3)
    assert x_hat3.shape == (b2, s2, n_head, d_head)
    assert bool(jnp.all(jnp.isfinite(x_hat3)))
    rel_err = jnp.linalg.norm(x_hat3 - x_hat2_ref) / jnp.linalg.norm(x_hat2_ref)
    assert float(rel_err) < 0.03

    print("KERNEL_OK")
</pallas_src>

<mosaic_0001>
module attributes {stable_mosaic.version = 11 : i64} {
  func.func @_encode_decode_kernel(%arg0: i32, %arg1: i32, %arg2: memref<8x128xf32, #tpu.memory_space<vmem>>, %arg3: memref<1x128xf32, #tpu.memory_space<vmem>>, %arg4: memref<1x128x128xf32, #tpu.memory_space<vmem>>, %arg5: memref<1x128x128xf32, #tpu.memory_space<vmem>>, %arg6: memref<8x128xf32, #tpu.memory_space<vmem>>, %arg7: memref<8x128xf32, #tpu.memory_space<vmem>>) attributes {dimension_semantics = [#tpu.dimension_semantics<parallel>, #tpu.dimension_semantics<parallel>], iteration_bounds = array<i64: 1, 2>, scalar_prefetch = 0 : i64, scratch_operands = 0 : i64, tpu.core_type = #tpu.core_type<tc>, window_params = [{transform_indices = @transform_0, window_bounds = array<i64: 8, 128>}, {transform_indices = @transform_1, window_bounds = array<i64: 1, 128>}, {transform_indices = @transform_2, window_bounds = array<i64: 1, 128, 128>}, {transform_indices = @transform_3, window_bounds = array<i64: 1, 128, 128>}, {transform_indices = @transform_4, window_bounds = array<i64: 8, 128>}, {transform_indices = @transform_5, window_bounds = array<i64: 8, 128>}]} {
    %c0 = arith.constant 0 : index
    %c0_0 = arith.constant 0 : index
    %0 = vector.load %arg2[%c0, %c0_0] : memref<8x128xf32, #tpu.memory_space<vmem>>, vector<8x128xf32>
    %c0_1 = arith.constant 0 : index
    %c0_2 = arith.constant 0 : index
    %1 = vector.load %arg3[%c0_1, %c0_2] : memref<1x128xf32, #tpu.memory_space<vmem>>, vector<1x128xf32>
    %2 = vector.broadcast %1 : vector<1x128xf32> to vector<8x128xf32>
    %3 = arith.subf %0, %2 : vector<8x128xf32>
    %c0_3 = arith.constant 0 : index
    %c0_4 = arith.constant 0 : index
    %c0_5 = arith.constant 0 : index
    %4 = vector.load %arg4[%c0_3, %c0_4, %c0_5] : memref<1x128x128xf32, #tpu.memory_space<vmem>>, vector<1x128x128xf32>
    %5 = vector.shape_cast %4 : vector<1x128x128xf32> to vector<128x128xf32>
    %cst = arith.constant dense<0.000000e+00> : vector<8x128xf32>
    %6 = tpu.matmul %3, %5, %cst {dimension_numbers = #tpu.dot_dimension_numbers<[1], [0], [0], [1], [0, 0, 1, 1], [], []>, precision = #tpu.contract_precision<fp32>} : vector<8x128xf32>, vector<128x128xf32>, vector<8x128xf32> -> vector<8x128xf32>
    %c0_6 = arith.constant 0 : index
    %c0_7 = arith.constant 0 : index
    %c0_8 = arith.constant 0 : index
    %7 = vector.load %arg5[%c0_6, %c0_7, %c0_8] : memref<1x128x128xf32, #tpu.memory_space<vmem>>, vector<1x128x128xf32>
    %8 = vector.shape_cast %7 : vector<1x128x128xf32> to vector<128x128xf32>
    %cst_9 = arith.constant dense<0.000000e+00> : vector<8x128xf32>
    %9 = tpu.matmul %6, %8, %cst_9 {dimension_numbers = #tpu.dot_dimension_numbers<[1], [0], [0], [1], [0, 0, 1, 1], [], []>, precision = #tpu.contract_precision<fp32>} : vector<8x128xf32>, vector<128x128xf32>, vector<8x128xf32> -> vector<8x128xf32>
    %c0_10 = arith.constant 0 : index
    %c0_11 = arith.constant 0 : index
    %10 = vector.load %arg3[%c0_10, %c0_11] : memref<1x128xf32, #tpu.memory_space<vmem>>, vector<1x128xf32>
    %11 = vector.broadcast %10 : vector<1x128xf32> to vector<8x128xf32>
    %12 = arith.addf %9, %11 : vector<8x128xf32>
    %c0_12 = arith.constant 0 : index
    %c0_13 = arith.constant 0 : index
    %13 = vector.load %arg7[%c0_12, %c0_13] : memref<8x128xf32, #tpu.memory_space<vmem>>, vector<8x128xf32>
    tpu.vector_store %arg7[%c0_12, %c0_13], %6 {strides = array<i32>} : memref<8x128xf32, #tpu.memory_space<vmem>>, vector<8x128xf32>,
    %c0_14 = arith.constant 0 : index
    %c0_15 = arith.constant 0 : index
    %14 = vector.load %arg6[%c0_14, %c0_15] : memref<8x128xf32, #tpu.memory_space<vmem>>, vector<8x128xf32>
    tpu.vector_store %arg6[%c0_14, %c0_15], %12 {strides = array<i32>} : memref<8x128xf32, #tpu.memory_space<vmem>>, vector<8x128xf32>,
    return
  }
  func.func @transform_0(%arg0: i32, %arg1: i32) -> (i32, i32) {
    %c0_i32 = arith.constant 0 : i32
    return %arg1, %arg0 : i32, i32
  }
  func.func @transform_1(%arg0: i32, %arg1: i32) -> (i32, i32) {
    %c0_i32 = arith.constant 0 : i32
    %c0_i32_0 = arith.constant 0 : i32
    return %c0_i32, %arg0 : i32, i32
  }
  func.func @transform_2(%arg0: i32, %arg1: i32) -> (i32, i32, i32) {
    %c0_i32 = arith.constant 0 : i32
    %c0_i32_0 = arith.constant 0 : i32
    %c0_i32_1 = arith.constant 0 : i32
    return %arg0, %c0_i32, %c0_i32_0 : i32, i32, i32
  }
  func.func @transform_3(%arg0: i32, %arg1: i32) -> (i32, i32, i32) {
    %c0_i32 = arith.constant 0 : i32
    %c0_i32_0 = arith.constant 0 : i32
    %c0_i32_1 = arith.constant 0 : i32
    return %arg0, %c0_i32, %c0_i32_0 : i32, i32, i32
  }
  func.func @transform_4(%arg0: i32, %arg1: i32) -> (i32, i32) {
    %c0_i32 = arith.constant 0 : i32
    return %arg1, %arg0 : i32, i32
  }
  func.func @transform_5(%arg0: i32, %arg1: i32) -> (i32, i32) {
    %c0_i32 = arith.constant 0 : i32
    return %arg1, %arg0 : i32, i32
  }
}

</mosaic_0001>

<bundles_post_ra>
// kernel: tpu_custom_call.1
= control target key start
LH: loop header
LB: loop body
LE: loop exit
PB: predicated region body
PF: predicated region fallthrough
CT: control target
= control target key end

     0   :  { %s2333_s0 = inlined_call_operand.hbm [shape: f32[16,128], index: 0, kind: input, shape index: {}]   ;;  %s2334_s1 = inlined_call_operand.hbm [shape: f32[1,128], index: 1, kind: input, shape index: {}]   ;;  %s2335_s2 = inlined_call_operand.hbm [shape: f32[1,128,128], index: 2, kind: input, shape index: {}]   ;;  %s2336_s3 = inlined_call_operand.hbm [shape: f32[1,128,128], index: 3, kind: input, shape index: {}]   ;;  %s2337_s4 = inlined_call_operand.hbm [shape: f32[16,128], index: 4, kind: output, shape index: {0}]   ;;  %s2338_s5 = inlined_call_operand.hbm [shape: f32[16,128], index: 5, kind: output, shape index: {1}]  }
   0x1   :  { %2339 = sst [smem:[#allocation18_spill]] %s2334_s1 }
   0x2   :  { %11 = vsyncpa [#allocation3], 0 }
   0x3   :  { %13 = vsyncpa [#allocation3 + $0x1], 0 }
   0x4   :  { %14 = vsyncpa [#allocation6], 0 }
   0x5   :  { %15 = vsyncpa [#allocation9], 0 }
   0x6   :  { %16 = vsyncpa [#allocation4], 0 }
   0x7   :  { %18 = vsyncpa [#allocation4 + $0x1], 0 }
   0x8   :  { %19 = vsyncpa [#allocation12], 0 }
   0x9   :  { %21 = vsyncpa [#allocation12 + $0x1], 0  ;;  %s1651_s18 = smov 0   ;;  %s1653_s19 = smov 0  }
   0xa   :  { %s1655_s20 = smov 0   ;;  %s1657_s21 = smov 0  }
   0xb   :  { %s1659_s22 = smov 0   ;;  %s1661_s23 = smov 0  }
   0xc LB: > { %s1249_s24 = sadd.s32 4294967295, %s1614_s23   ;;  %s1250_s25 = sadd.s32 4294967294, %s1614_s23   ;;  %s1614_s23 = sphi %s1661_s23, %s27_s23   ;;  %s1610_s22 = sphi %s1659_s22, %s2353_s22   ;;  %s1606_s21 = sphi %s1657_s21, %s2352_s21   ;;  %s1602_s20 = sphi %s1655_s20, %s2351_s20   ;;  %s1598_s19 = sphi %s1653_s19, %s2350_s19   ;;  %s1594_s18 = sphi %s1651_s18, %s2349_s18  }
   0xd   : > { %p61_p0 = scmp.ne.s32.totalorder %s1598_s19, %s1594_s18  ;;  %p1685_p1 = scmp.eq.s32.totalorder %s1249_s24, 0 }
   0xe   : > { %p1689_p2 = scmp.eq.s32.totalorder %s1249_s24, 1  ;;  %p171_p3 = scmp.eq.s32.totalorder %s1250_s25, 1 }
   0xf   : > { %p1695_p4 = por %p1685_p1, %p61_p0  ;;  %p1251_p5 = scmp.ge.s32.totalorder %s1614_s23, 1 }
  0x10   : > { %p1700_p6 = por %p171_p3, %p61_p0  ;;  %p206_p7 = scmp.lt.s32.totalorder %s1614_s23, 3 }
  0x11   : > { %s2344_s1 = sld [smem:[#allocation18_spill]]  ;;  %p1255_p9 = scmp.ge.s32.totalorder %s1614_s23, 2 }
  0x12   : > { %p1708_p8 = pnand %p1251_p5, %p206_p7  ;;  %s1616_s9 = smov [#allocation5]  }
  0x13   : > { %s221_s10 = sshll.u32 %s1616_s9, 4  ;;  %s233_s13 = sshll.u32 %s2335_s2, 4  ;;  %s222_s10 = int_to_ptr.vmem [resolvable:$true] %s221_s10  ;;  %s234_s13 = int_to_ptr.hbm [resolvable:$true] %s233_s13 }
  0x14   : > { %p1289_p10 = pneg %p1708_p8  ;;  %s1617_s15 = smov [#allocation7]  }
  0x15   : > { %s235_s16 = sshll.u32 %s1617_s15, 4  ;;  %s1618_s17 = smov 128   ;;  %s236_s16 = int_to_ptr.vmem [resolvable:$true] %s235_s16 }
  0x16   : > { %p1720_p11 = pnand %p1289_p10, %p1685_p1  ;;  %s1619_s24 = smov 8  }
  0x17   : > { %s219_s7 = sshll.u32 %s2344_s1, 4  ;;  %s250_s6 = sshll.u32 %s2336_s3, 4  ;;  %s220_s7 = int_to_ptr.hbm [resolvable:$true] %s219_s7  ;;  %s251_s6 = int_to_ptr.hbm [resolvable:$true] %s250_s6 }
  0x18   : > { %1292 = dma.hbm_to_vmem [thread:$0]  (!%p1720_p11), %s220_s7, 16, %s222_s10, [#allocation6]  }
  0x19   : > { %1295 = dma.hbm_to_vmem [thread:$0]  (!%p1720_p11), %s234_s13, 2048, %s236_s16, [#allocation6], %s1618_s17, %s1618_s17, %s1619_s24  }
  0x1a   : > { %s1620_s9 = smov [#allocation8]   ;;  %s48_s7 = sadd.s32 1, %s1602_s20 }
  0x1b   : > { %s252_s11 = sshll.u32 %s1620_s9, 4  ;;  %s36_s10 = sadd.s32 1, %s1610_s22  ;;  %s253_s11 = int_to_ptr.vmem [resolvable:$true] %s252_s11 }
  0x1c   : > { %1298 = dma.hbm_to_vmem [thread:$0]  (!%p1720_p11), %s251_s6, 2048, %s253_s11, [#allocation9], %s1618_s17, %s1618_s17, %s1619_s24  }
  0x1d   : > { %p55_p12 = scmp.ne.s32.totalorder %s1602_s20, %s1598_s19  ;;  %p37_p13 = scmp.ge.s32.totalorder %s36_s10, 2 }
  0x1e   : > { %p56_p0 = scmp.eq.s32.totalorder %s1614_s23, 0  ;;  %p1313_p5 = scmp.lt.s32.totalorder %s1614_s23, 2 }
  0x1f   : > { %p1740_p3 = por %p1689_p2, %p55_p12  ;;  %s2355_s10 = smov (%p37_p13, %s36_s10), 0 }
  0x20   : > { %p1747_p7 = por %p56_p0, %p55_p12  ;;  %s266_s14 = sand.u32 1, %s1602_s20  }
  0x21   : > { %s43_s15 = ssub.s32 %s1610_s22, %s2355_s10  ;;  %s1256_s16 = sshll.u32 %s266_s14, 3 }
  0x22   : > { %p46_p10 = scmp.eq.s32.totalorder %s43_s15, 0  ;;  %s1257_s17 = sshll.u32 %s1610_s22, 3 }
  0x23   : > { %s275_s30 = scalar_lea.hbm %s2333_s0, %s1257_s17  ;;  %s270_s6 = scalar_lea.vmem [#allocation2], %s1256_s16 }
  0x24   : > { %s1756_s27 = scalar_select %p46_p10, %s1602_s20, %s48_s7  }
  0x25   : > { %s279_s9 = sshll.u32 %s270_s6, 4  ;;  %s277_s11 = sshll.u32 %s275_s30, 4  ;;  %s280_s9 = int_to_ptr.vmem [resolvable:$true] %s279_s9  ;;  %s278_s11 = int_to_ptr.hbm [resolvable:$true] %s277_s11 }
  0x26   : > { %p1300_p2 = pnand %p1313_p5, %p1747_p7  ;;  %s267_s1 = scalar_lea.sflag [#allocation3], %s266_s14 }
  0x27   : > { %288 = sbr.rel (%p1708_p8) target bundleno = 408 (0x198), region = 36  ;;  %s1768_s7 = sand.u32 (!%p1708_p8), 1, %s1598_s19  }
  0x28   : > { %1302 = dma.hbm_to_vmem [thread:$0]  (!%p1300_p2), %s278_s11, 128, %s280_s9, %s267_s1  }
  0x29   : > { %s1771_s15 = sshll.u32 (!%p1708_p8), %s1768_s7, 3  ;;  %s291_s16 = scalar_lea.sflag (!%p1708_p8), [#allocation3], %s1768_s7 }
  0x2a   : > { %s294_s17 = scalar_lea.vmem (!%p1708_p8), [#allocation2], %s1771_s15 }
  0x2c   : > { %1573 = dma.done.wait (%p1695_p4), %s291_s16, 128  }
  0x2d   : > { %1575 = vsyncadd (%p1695_p4), %s291_s16, 4294967168 }
  0x2e   : > { %1577 = dma.done.wait (%p1685_p1), [#allocation6], 2064  }
  0x2f   : > { %1579 = vsyncadd (%p1685_p1), [#allocation6], 4294965232 }
  0x30   : > { %1581 = dma.done.wait (%p1685_p1), [#allocation9], 2048  }
  0x31   : > { %1583 = vsyncadd (%p1685_p1), [#allocation9], 4294965248  ;;  %v363_v0 = vld [vmem:[#allocation7 + $0x78] sm:$0xff]  ;;  %v362_v1 = vld [vmem:[#allocation7 + $0x70] sm:$0xff]  ;;  %s341_s1 = scalar_lea.vmem [#allocation11], %s1771_s15  ;;  %s1267_s26 = sshll.u32 %s1606_s21, 3 }
  0x32   : > { %v361_v2 = vld [vmem:[#allocation7 + $0x68] sm:$0xff]  ;;  %v1787_v3 = vand.u32 4294901760, %v363_v0  ;;  %v1789_v4 = vand.u32 4294901760, %v362_v1  ;;  %v360_v6 = vld [vmem:[#allocation7 + $0x60] sm:$0xff]  ;;  %v359_v7 = vld [vmem:[#allocation7 + $0x58] sm:$0xff]  ;;  %s1096_s13 = scalar_lea.hbm %s2338_s5, %s1267_s26  ;;  %s1098_s14 = sshll.u32 %s341_s1, 4  ;;  %s1099_s14 = int_to_ptr.vmem [resolvable:$true] %s1098_s14 }
  0x33   : > { %v1791_v5 = vand.u32 4294901760, %v361_v2  ;;  %v358_v8 = vld [vmem:[#allocation7 + $0x50] sm:$0xff]  ;;  %v1793_v9 = vand.u32 4294901760, %v360_v6  ;;  %v1795_v10 = vand.u32 4294901760, %v359_v7  ;;  %v357_v12 = vld [vmem:[#allocation7 + $0x48] sm:$0xff]  ;;  %v356_v13 = vld [vmem:[#allocation7 + $0x40] sm:$0xff] }
  0x34   : > { %v1797_v11 = vand.u32 4294901760, %v358_v8  ;;  %365 = vmatpush.msra.mxu0 %v1787_v3  ;;  %v1801_v14 = vsub.f32 %v363_v0, %v1787_v3  ;;  %v1804_v15 = vsub.f32 %v362_v1, %v1789_v4  ;;  %v1809_v17 = vand.u32 4294901760, %v357_v12  ;;  %v355_v18 = vld [vmem:[#allocation7 + $0x38] sm:$0xff]  ;;  %561 = vmatpush.msra.mxu3 %v1787_v3  ;;  %v354_v26 = vld [vmem:[#allocation7 + $0x30] sm:$0xff]  ;;  %v353_v36 = vld [vmem:[#allocation7 + $0x28] sm:$0xff]  ;;  %s1100_s24 = sshll.u32 %s1096_s13, 4  ;;  %s1101_s24 = int_to_ptr.hbm [resolvable:$true] %s1100_s24 }
  0x35   : > { %v1807_v16 = vsub.f32 %v361_v2, %v1791_v5  ;;  %v1813_v19 = vsub.f32 %v360_v6, %v1793_v9  ;;  %v1816_v20 = vsub.f32 %v359_v7, %v1795_v10  ;;  %v1825_v25 = vand.u32 4294901760, %v356_v13  ;;  %v352_v42 = vld [vmem:[#allocation7 + $0x20] sm:$0xff]  ;;  %v351_v47 = vld [vmem:[#allocation7 + $0x18] sm:$0xff]  ;;  %v350_v55 = vld [vmem:[#allocation7 + $0x10] sm:$0xff]  ;;  %s1070_s25 = scalar_lea.sflag [#allocation12], %s1768_s7  ;;  %s1506_s30 = sshra.s32 %s1101_s24, 4  ;;  %s1507_s30 = int_to_ptr.hbm [resolvable:$true] %s1506_s30 }
  0x36   : > { %v1819_v21 = vsub.f32 %v358_v8, %v1797_v11  ;;  %367 = vmatpush.msra.mxu0 %v1789_v4  ;;  %v407_v22 = vand.u32 4294901760, %v1801_v14  ;;  %v413_v23 = vand.u32 4294901760, %v1804_v15  ;;  %508 = vmatpush.msra.mxu2 %v1801_v14  ;;  %v1829_v28 = vand.u32 4294901760, %v355_v18  ;;  %v1894_v59 = vld [vmem:[#allocation5] ss:$0 sm:$0xff]  ;;  %v349_v61 = vld [vmem:[#allocation7 + $0x8] sm:$0xff]  ;;  %p1513_p11 = scmp.lt.s32.totalorder %s1507_s30, %s2338_s5 }
  0x37   : > { %v419_v24 = vand.u32 4294901760, %v1807_v16  ;;  %v425_v27 = vand.u32 4294901760, %v1813_v19  ;;  %v1832_v29 = vsub.f32 %v357_v12, %v1809_v17  ;;  %563 = vmatpush.msra.mxu3 %v1789_v4  ;;  %v431_v33 = vand.u32 4294901760, %v1816_v20  ;;  %v342_v62 = vld [vmem:[%s294_s17] sm:$0xff]  ;;  %v348_v6 = vld [vmem:[#allocation7] sm:$0xff]  ;;  %s1508_s6 = scalar_lea.hbm %s1507_s30, 8 }
  0x38   : > { %369 = vmatpush.msra.mxu0 %v1791_v5  ;;  %v408_v30 = vsub.f32 %v1801_v14, %v407_v22  ;;  %v414_v31 = vsub.f32 %v1804_v15, %v413_v23  ;;  %511 = vmatpush.msra.mxu2 %v1804_v15  ;;  %v437_v34 = vand.u32 4294901760, %v1819_v21  ;;  %v1848_v35 = vand.u32 4294901760, %v354_v26  ;;  %v720_v14 = vld [vmem:[#allocation8 + $0x78] sm:$0xff]  ;;  %p1509_p1 = scmp.ne.s32.totalorder %s1507_s30, %s1508_s6  ;;  %s1512_s21 = scalar_lea.hbm %s2338_s5, 16 }
  0x39   : > { %v420_v32 = vsub.f32 %v1807_v16, %v419_v24  ;;  %565 = vmatpush.msra.mxu3 %v1791_v5  ;;  %v426_v39 = vsub.f32 %v1813_v19, %v425_v27  ;;  %v1856_v40 = vsub.f32 %v356_v13, %v1825_v25  ;;  %v443_v41 = vand.u32 4294901760, %v1832_v29  ;;  %p1514_p12 = scmp.lt.s32.totalorder %s1512_s21, %s1508_s6 }
  0x3a   : > { %v409_v37 = vand.u32 4294901760, %v408_v30  ;;  %371 = vmatpush.msra.mxu0 %v1793_v9  ;;  %v415_v38 = vand.u32 4294901760, %v414_v31  ;;  %514 = vmatpush.msra.mxu2 %v1807_v16  ;;  %v432_v44 = vsub.f32 %v1816_v20, %v431_v33  ;;  %v1865_v45 = vand.u32 4294901760, %v353_v36  ;;  %p1510_p4 = pnand %p1509_p1, %p1740_p3 }
  0x3b   : > { %567 = vmatpush.msra.mxu3 %v1793_v9  ;;  %v421_v43 = vand.u32 4294901760, %v420_v32  ;;  %v1868_v46 = vsub.f32 %v355_v18, %v1829_v28  ;;  %v449_v48 = vand.u32 4294901760, %v1856_v40  ;;  %v427_v49 = vand.u32 4294901760, %v426_v39  ;;  %p1515_p13 = por %p1514_p12, %p1513_p11 }
  0x3c   : > { %410 = vmatpush.msra.mxu1 %v409_v37  ;;  %373 = vmatpush.msra.mxu0 %v1795_v10  ;;  %v438_v50 = vsub.f32 %v1819_v21, %v437_v34  ;;  %v1877_v51 = vand.u32 4294901760, %v352_v42  ;;  %v1880_v52 = vsub.f32 %v354_v26, %v1848_v35  ;;  %v444_v53 = vsub.f32 %v1832_v29, %v443_v41  ;;  %p1511_p8 = pneg %p1510_p4 }
  0x3d   : > { %517 = vmatpush.msra.mxu2 %v1813_v19  ;;  %569 = vmatpush.msra.mxu3 %v1795_v10  ;;  %v1885_v54 = vand.u32 4294901760, %v351_v47  ;;  %v433_v56 = vand.u32 4294901760, %v432_v44  ;;  %v455_v57 = vand.u32 4294901760, %v1868_v46  ;;  %v1892_v58 = vsub.f32 %v353_v36, %v1865_v45 }
  0x3e   : > { %416 = vmatpush.msra.mxu1 %v415_v38  ;;  %375 = vmatpush.msra.mxu0 %v1797_v11  ;;  %v450_v60 = vsub.f32 %v1856_v40, %v449_v48  ;;  %v439_v63 = vand.u32 4294901760, %v438_v50  ;;  %v461_v0 = vand.u32 4294901760, %v1880_v52  ;;  %v1905_v1 = vand.u32 4294901760, %v350_v55  ;;  %p1516_p0 = pnand %p1515_p13, %p1511_p8 }
  0x3f   : > { %520 = vmatpush.msra.mxu2 %v1816_v20  ;;  %571 = vmatpush.msra.mxu3 %v1797_v11  ;;  %v1908_v2 = vsub.f32 %v352_v42, %v1877_v51  ;;  %v445_v7 = vand.u32 4294901760, %v444_v53  ;;  %v1911_v8 = vsub.f32 %v351_v47, %v1885_v54  ;;  %v456_v12 = vsub.f32 %v1868_v46, %v455_v57  ;;  %v713_v20 = vld [vmem:[#allocation8 + $0x40] sm:$0xff] }
  0x40   : > { %422 = vmatpush.msra.mxu1 %v421_v43  ;;  %377 = vmatpush.msra.mxu0 %v1809_v17  ;;  %v467_v13 = vand.u32 4294901760, %v1892_v58  ;;  %v1920_v18 = vand.u32 4294901760, %v349_v61  ;;  %v347_v26 = vsub.f32 %v342_v62, %v1894_v59  ;;  %v451_v30 = vand.u32 4294901760, %v450_v60 }
  0x41   : > { %523 = vmatpush.msra.mxu2 %v1819_v21  ;;  %573 = vmatpush.msra.mxu3 %v1809_v17  ;;  %v1923_v31 = vand.u32 4294901760, %v348_v6  ;;  %v462_v32 = vsub.f32 %v1880_v52, %v461_v0  ;;  %v473_v36 = vand.u32 4294901760, %v1908_v2  ;;  %v1933_v37 = vsub.f32 %v350_v55, %v1905_v1 }
  0x42   : > { %428 = vmatpush.msra.mxu1 %v427_v49  ;;  %379 = vmatpush.msra.mxu0 %v1825_v25  ;;  %v1935_v38 = vand.u32 4294901760, %v347_v26  ;;  %v479_v39 = vand.u32 4294901760, %v1911_v8  ;;  %v457_v42 = vand.u32 4294901760, %v456_v12  ;;  %v468_v43 = vsub.f32 %v1892_v58, %v467_v13 }
  0x43   : > { %526 = vmatpush.msra.mxu2 %v1832_v29  ;;  %575 = vmatpush.msra.mxu3 %v1825_v25  ;;  %v1945_v44 = vsub.f32 %v349_v61, %v1920_v18  ;;  %v463_v49 = vand.u32 4294901760, %v462_v32  ;;  %v474_v50 = vsub.f32 %v1908_v2, %v473_v36  ;;  %v485_v53 = vand.u32 4294901760, %v1933_v37 }
  0x44   : > { %434 = vmatpush.msra.mxu1 %v433_v56  ;;  %381 = vmatpush.msra.mxu0 %v1829_v28  ;;  %v397_v47 = vsub.f32 %v347_v26, %v1935_v38  ;;  %v1956_v55 = vsub.f32 %v348_v6, %v1923_v31  ;;  %v469_v56 = vand.u32 4294901760, %v468_v43  ;;  %v480_v60 = vsub.f32 %v1911_v8, %v479_v39 }
  0x45   : > { %529 = vmatpush.msra.mxu2 %v1856_v40  ;;  %577 = vmatpush.msra.mxu3 %v1829_v28  ;;  %v491_v61 = vand.u32 4294901760, %v1945_v44  ;;  %v486_v6 = vsub.f32 %v1933_v37, %v485_v53  ;;  %v1998_v15 = vand.u32 4294901760, %v720_v14  ;;  %v712_v40 = vld [vmem:[#allocation8 + $0x38] sm:$0xff] }
  0x46   : > { %440 = vmatpush.msra.mxu1 %v439_v63  ;;  %383 = vmatpush.msra.mxu0 %v1848_v35  ;;  %v398_v62 = vand.u32 4294901760, %v397_v47  ;;  %v475_v63 = vand.u32 4294901760, %v474_v50  ;;  %v481_v12 = vand.u32 4294901760, %v480_v60  ;;  %v715_v60 = vld [vmem:[#allocation8 + $0x50] sm:$0xff] }
  0x47   : > { %532 = vmatpush.msra.mxu2 %v1868_v46  ;;  %579 = vmatpush.msra.mxu3 %v1848_v35  ;;  %v492_v26 = vsub.f32 %v1945_v44, %v491_v61  ;;  %v487_v32 = vand.u32 4294901760, %v486_v6  ;;  %v2077_v46 = vand.u32 4294901760, %v712_v40 }
  0x48   : > { %446 = vmatpush.msra.mxu1 %v445_v7  ;;  %385 = vmatpush.msra.mxu0 %v1865_v45  ;;  %v497_v7 = vand.u32 4294901760, %v1956_v55 }
  0x49   : > { %535 = vmatpush.msra.mxu2 %v1880_v52  ;;  %581 = vmatpush.msra.mxu3 %v1865_v45  ;;  %v493_v43 = vand.u32 4294901760, %v492_v26  ;;  %v2092_v52 = vsub.f32 %v712_v40, %v2077_v46 }
  0x4a   : > { %452 = vmatpush.msra.mxu1 %v451_v30  ;;  %387 = vmatpush.msra.mxu0 %v1877_v51  ;;  %v399_v30 = vsub.f32 %v397_v47, %v398_v62 }
  0x4b   : > { %538 = vmatpush.msra.mxu2 %v1892_v58  ;;  %583 = vmatpush.msra.mxu3 %v1877_v51 }
  0x4c   : > { %458 = vmatpush.msra.mxu1 %v457_v42  ;;  %389 = vmatpush.msra.mxu0 %v1885_v54  ;;  %v498_v42 = vsub.f32 %v1956_v55, %v497_v7 }
  0x4d   : > { %541 = vmatpush.msra.mxu2 %v1908_v2  ;;  %585 = vmatpush.msra.mxu3 %v1885_v54  ;;  %v706_v2 = vld [vmem:[#allocation8 + $0x8] sm:$0xff] }
  0x4e   : > { %464 = vmatpush.msra.mxu1 %v463_v49  ;;  %391 = vmatpush.msra.mxu0 %v1905_v1  ;;  %v400_v49 = vand.u32 4294901760, %v399_v30  ;;  %v499_v50 = vand.u32 4294901760, %v498_v42 }
  0x4f   : > { %544 = vmatpush.msra.mxu2 %v1911_v8  ;;  %587 = vmatpush.msra.mxu3 %v1905_v1  ;;  %v705_v8 = vld [vmem:[#allocation8] sm:$0xff] }
  0x50   : > { %470 = vmatpush.msra.mxu1 %v469_v56  ;;  %393 = vmatpush.msra.mxu0 %v1920_v18  ;;  %v718_v56 = vld [vmem:[#allocation8 + $0x68] sm:$0xff] }
  0x51   : > { %547 = vmatpush.msra.mxu2 %v1933_v37  ;;  %589 = vmatpush.msra.mxu3 %v1920_v18  ;;  %v2002_v16 = vand.u32 4294901760, %v718_v56 }
  0x52   : > { %476 = vmatpush.msra.mxu1 %v475_v63  ;;  %395 = vmatpush.msra.mxu0 %v1923_v31 }
  0x53   : > { %550 = vmatpush.msra.mxu2 %v1945_v44  ;;  %591 = vmatpush.msra.mxu3 %v1923_v31  ;;  %v2021_v6 = vsub.f32 %v718_v56, %v2002_v16 }
  0x54   : > { %602 = vmatpush.msrb.mxu0 %v407_v22  ;;  %482 = vmatpush.msra.mxu1 %v481_v12  ;;  %v719_v22 = vld [vmem:[#allocation8 + $0x70] sm:$0xff] }
  0x55   : > { %553 = vmatpush.msra.mxu2 %v1956_v55  ;;  %595 = vmatmul.f32.vlgmr.msra.gmra.mxu3 %v398_v62  ;;  %v2009_v62 = vand.u32 4294901760, %v715_v60  ;;  %v776_v30 = vand.u32 4294901760, %v2021_v6 }
  0x56   : > { %606 = vmatpush.msrb.mxu0 %v413_v23  ;;  %488 = vmatpush.msra.mxu1 %v487_v32  ;;  %v2000_v23 = vand.u32 4294901760, %v719_v22  ;;  %v2038_v32 = vand.u32 4294901760, %v713_v20 }
  0x57   : > { %556 = vmatmul.f32.vlgmr.msra.gmra.mxu2 %v397_v47  ;;  %401 = vmatmul.f32.vlgmr.msra.gmra.mxu0 %v400_v49  ;;  %v716_v47 = vld [vmem:[#allocation8 + $0x58] sm:$0xff]  ;;  %v777_v49 = vsub.f32 %v2021_v6, %v776_v30 }
  0x58   : > { %610 = vmatpush.msrb.mxu0 %v419_v24  ;;  %494 = vmatpush.msra.mxu1 %v493_v43  ;;  %v717_v24 = vld [vmem:[#allocation8 + $0x60] sm:$0xff]  ;;  %v2018_v63 = vsub.f32 %v719_v22, %v2000_v23  ;;  %v2043_v43 = vsub.f32 %v715_v60, %v2009_v62  ;;  %v710_v22 = vld [vmem:[#allocation8 + $0x28] sm:$0xff] }
  0x59   : > { %v2005_v19 = vand.u32 4294901760, %v717_v24  ;;  %722 = vmatpush.msrb.mxu2 %v1998_v15  ;;  %v709_v60 = vld [vmem:[#allocation8 + $0x20] sm:$0xff] }
  0x5a   : > { %614 = vmatpush.msrb.mxu0 %v425_v27  ;;  %500 = vmatpush.msra.mxu1 %v499_v50  ;;  %v2007_v27 = vand.u32 4294901760, %v716_v47 }
  0x5b   : > { %502 = vmatmul.f32.vlgmr.msra.gmra.mxu1 %v1935_v38  ;;  %v2026_v26 = vsub.f32 %v717_v24, %v2005_v19  ;;  %724 = vmatpush.msrb.mxu2 %v2000_v23 }
  0x5c   : > { %669 = vmatpush.msrb.mxu1 %v1787_v3  ;;  %618 = vmatpush.msrb.mxu0 %v431_v33  ;;  %v714_v3 = vld [vmem:[#allocation8 + $0x48] sm:$0xff]  ;;  %v2015_v33 = vsub.f32 %v720_v14, %v1998_v15  ;;  %v2066_v14 = vsub.f32 %v713_v20, %v2038_v32 }
  0x5d   : > { %v2023_v12 = vand.u32 4294901760, %v714_v3  ;;  %v782_v42 = vand.u32 4294901760, %v2026_v26  ;;  %726 = vmatpush.msrb.mxu2 %v2002_v16 }
  0x5e   : > { %671 = vmatpush.msrb.mxu1 %v1789_v4  ;;  %622 = vmatpush.msrb.mxu0 %v437_v34  ;;  %v2030_v4 = vsub.f32 %v716_v47, %v2007_v27  ;;  %v764_v21 = vand.u32 4294901760, %v2015_v33  ;;  %v770_v34 = vand.u32 4294901760, %v2018_v63  ;;  %v794_v47 = vand.u32 4294901760, %v2043_v43 }
  0x5f   : > { %v783_v24 = vsub.f32 %v2026_v26, %v782_v42  ;;  %728 = vmatpush.msrb.mxu2 %v2005_v19 }
  0x60   : > { %673 = vmatpush.msrb.mxu1 %v1791_v5  ;;  %626 = vmatpush.msrb.mxu0 %v443_v41  ;;  %v765_v5 = vsub.f32 %v2015_v33, %v764_v21  ;;  %v771_v29 = vsub.f32 %v2018_v63, %v770_v34  ;;  %v2055_v41 = vsub.f32 %v714_v3, %v2023_v12  ;;  %v778_v3 = vand.u32 4294901760, %v777_v49 }
  0x61   : > { %730 = vmatpush.msrb.mxu2 %v2007_v27  ;;  %v795_v49 = vsub.f32 %v2043_v43, %v794_v47 }
  0x62   : > { %675 = vmatpush.msrb.mxu1 %v1793_v9  ;;  %630 = vmatpush.msrb.mxu0 %v449_v48  ;;  %v788_v9 = vand.u32 4294901760, %v2030_v4  ;;  %v711_v48 = vld [vmem:[#allocation8 + $0x30] sm:$0xff]  ;;  %v766_v50 = vand.u32 4294901760, %v765_v5  ;;  %v772_v56 = vand.u32 4294901760, %v771_v29  ;;  %v2085_v5 = vand.u32 4294901760, %v710_v22 }
  0x63   : > { %v784_v29 = vand.u32 4294901760, %v783_v24  ;;  %732 = vmatpush.msrb.mxu2 %v2009_v62 }
  0x64   : > { %677 = vmatpush.msrb.mxu1 %v1795_v10  ;;  %634 = vmatpush.msrb.mxu0 %v455_v57  ;;  %v800_v10 = vand.u32 4294901760, %v2055_v41  ;;  %v2079_v57 = vand.u32 4294901760, %v711_v48  ;;  %v789_v20 = vsub.f32 %v2030_v4, %v788_v9 }
  0x65   : > { %767 = vmatpush.msrb.mxu3 %v766_v50  ;;  %734 = vmatpush.msrb.mxu2 %v2023_v12 }
  0x66   : > { %679 = vmatpush.msrb.mxu1 %v1797_v11  ;;  %638 = vmatpush.msrb.mxu0 %v461_v0  ;;  %v806_v11 = vand.u32 4294901760, %v2066_v14  ;;  %v708_v0 = vld [vmem:[#allocation8 + $0x18] sm:$0xff]  ;;  %v2099_v50 = vsub.f32 %v711_v48, %v2079_v57  ;;  %v801_v58 = vsub.f32 %v2055_v41, %v800_v10  ;;  %v790_v40 = vand.u32 4294901760, %v789_v20 }
  0x67   : > { %773 = vmatpush.msrb.mxu3 %v772_v56  ;;  %v812_v56 = vand.u32 4294901760, %v2092_v52  ;;  %v2112_v48 = vsub.f32 %v710_v22, %v2085_v5  ;;  %v2114_v24 = vand.u32 4294901760, %v708_v0  ;;  %736 = vmatpush.msrb.mxu2 %v2038_v32 }
  0x68   : > { %681 = vmatpush.msrb.mxu1 %v1809_v17  ;;  %642 = vmatpush.msrb.mxu0 %v467_v13  ;;  %v2101_v17 = vand.u32 4294901760, %v709_v60  ;;  %v707_v13 = vld [vmem:[#allocation8 + $0x10] sm:$0xff] }
  0x69   : > { %779 = vmatpush.msrb.mxu3 %v778_v3  ;;  %v818_v3 = vand.u32 4294901760, %v2099_v50  ;;  %v2127_v20 = vand.u32 4294901760, %v707_v13  ;;  %738 = vmatpush.msrb.mxu2 %v2077_v46 }
  0x6a   : > { %683 = vmatpush.msrb.mxu1 %v1825_v25  ;;  %646 = vmatpush.msrb.mxu0 %v473_v36  ;;  %v807_v25 = vsub.f32 %v2066_v14, %v806_v11  ;;  %v796_v36 = vand.u32 4294901760, %v795_v49  ;;  %v2125_v22 = vsub.f32 %v709_v60, %v2101_v17  ;;  %v2138_v60 = vsub.f32 %v708_v0, %v2114_v24 }
  0x6b   : > { %785 = vmatpush.msrb.mxu3 %v784_v29  ;;  %v824_v29 = vand.u32 4294901760, %v2112_v48  ;;  %v2140_v49 = vand.u32 4294901760, %v706_v2  ;;  %v819_v37 = vsub.f32 %v2099_v50, %v818_v3  ;;  %740 = vmatpush.msrb.mxu2 %v2079_v57  ;;  %v2151_v0 = vsub.f32 %v707_v13, %v2127_v20 }
  0x6c   : > { %685 = vmatpush.msrb.mxu1 %v1829_v28  ;;  %650 = vmatpush.msrb.mxu0 %v479_v39  ;;  %v802_v28 = vand.u32 4294901760, %v801_v58  ;;  %v813_v39 = vsub.f32 %v2092_v52, %v812_v56  ;;  %v2153_v58 = vand.u32 4294901760, %v705_v8 }
  0x6d   : > { %791 = vmatpush.msrb.mxu3 %v790_v40  ;;  %v825_v44 = vsub.f32 %v2112_v48, %v824_v29  ;;  %v2164_v13 = vsub.f32 %v706_v2, %v2140_v49  ;;  %742 = vmatpush.msrb.mxu2 %v2085_v5 }
  0x6e   : > { %687 = vmatpush.msrb.mxu1 %v1848_v35  ;;  %654 = vmatpush.msrb.mxu0 %v485_v53  ;;  %v808_v35 = vand.u32 4294901760, %v807_v25  ;;  %v830_v53 = vand.u32 4294901760, %v2125_v22  ;;  %v2174_v40 = vsub.f32 %v705_v8, %v2153_v58 }
  0x6f   : > { %797 = vmatpush.msrb.mxu3 %v796_v36  ;;  %v848_v2 = vand.u32 4294901760, %v2164_v13  ;;  %744 = vmatpush.msrb.mxu2 %v2101_v17 }
  0x70   : > { %689 = vmatpush.msrb.mxu1 %v1865_v45  ;;  %658 = vmatpush.msrb.mxu0 %v491_v61  ;;  %v814_v45 = vand.u32 4294901760, %v813_v39  ;;  %v836_v61 = vand.u32 4294901760, %v2138_v60  ;;  %v831_v55 = vsub.f32 %v2125_v22, %v830_v53 }
  0x71   : > { %803 = vmatpush.msrb.mxu3 %v802_v28  ;;  %v854_v28 = vand.u32 4294901760, %v2174_v40  ;;  %746 = vmatpush.msrb.mxu2 %v2114_v24  ;;  %v849_v8 = vsub.f32 %v2164_v13, %v848_v2 }
  0x72   : > { %691 = vmatpush.msrb.mxu1 %v1877_v51  ;;  %662 = vmatpush.msrb.mxu0 %v497_v7  ;;  %v820_v51 = vand.u32 4294901760, %v819_v37  ;;  %v842_v7 = vand.u32 4294901760, %v2151_v0  ;;  %v837_v25 = vsub.f32 %v2138_v60, %v836_v61  ;;  %v832_v36 = vand.u32 4294901760, %v831_v55 }
  0x73   : > { %664 = vmatmul.f32.vlgmr.msrb.gmra.mxu0 %v1935_v38  ;;  %809 = vmatpush.msrb.mxu3 %v808_v35 }
  0x74   : > { %693 = vmatpush.msrb.mxu1 %v1885_v54  ;;  %865 = vmatpush.msra.mxu0 %v2015_v33  ;;  %v826_v54 = vand.u32 4294901760, %v825_v44 }
  0x75   : > { %815 = vmatpush.msrb.mxu3 %v814_v45  ;;  %748 = vmatpush.msrb.mxu2 %v2127_v20 }
  0x76   : > { %695 = vmatpush.msrb.mxu1 %v1905_v1  ;;  %868 = vmatpush.msra.mxu0 %v2018_v63  ;;  %v843_v1 = vsub.f32 %v2151_v0, %v842_v7 }
  0x77   : > { %821 = vmatpush.msrb.mxu3 %v820_v51  ;;  %750 = vmatpush.msrb.mxu2 %v2140_v49 }
  0x78   : > { %697 = vmatpush.msrb.mxu1 %v1920_v18  ;;  %871 = vmatpush.msra.mxu0 %v2021_v6  ;;  %v838_v18 = vand.u32 4294901760, %v837_v25  ;;  %v844_v39 = vand.u32 4294901760, %v843_v1 }
  0x79   : > { %827 = vmatpush.msrb.mxu3 %v826_v54  ;;  %752 = vmatpush.msrb.mxu2 %v2153_v58 }
  0x7a   : > { %699 = vmatpush.msrb.mxu1 %v1923_v31  ;;  %874 = vmatpush.msra.mxu0 %v2026_v26  ;;  %v855_v31 = vsub.f32 %v2174_v40, %v854_v28 }
  0x7b   : > { %701 = vmatmul.f32.vlgmr.msrb.gmra.mxu1 %v1935_v38  ;;  %833 = vmatpush.msrb.mxu3 %v832_v36  ;;  %v850_v38 = vand.u32 4294901760, %v849_v8 }
  0x7c   : > { %918 = vmatpush.msra.mxu1 %v1998_v15  ;;  %877 = vmatpush.msra.mxu0 %v2030_v4  ;;  %v856_v35 = vand.u32 4294901760, %v855_v31 }
  0x7d   : > { %839 = vmatpush.msrb.mxu3 %v838_v18  ;;  %959 = vmatpush.msra.mxu2 %v764_v21 }
  0x7e   : > { %920 = vmatpush.msra.mxu1 %v2000_v23  ;;  %880 = vmatpush.msra.mxu0 %v2043_v43 }
  0x7f   : > { %845 = vmatpush.msrb.mxu3 %v844_v39  ;;  %963 = vmatpush.msra.mxu2 %v770_v34 }
  0x80   : > { %922 = vmatpush.msra.mxu1 %v2002_v16  ;;  %883 = vmatpush.msra.mxu0 %v2055_v41 }
  0x81   : > { %851 = vmatpush.msrb.mxu3 %v850_v38  ;;  %967 = vmatpush.msra.mxu2 %v776_v30 }
  0x82   : > { %924 = vmatpush.msra.mxu1 %v2005_v19  ;;  %886 = vmatpush.msra.mxu0 %v2066_v14 }
  0x83   : > { %857 = vmatpush.msrb.mxu3 %v856_v35  ;;  %971 = vmatpush.msra.mxu2 %v782_v42 }
  0x84   : > { %926 = vmatpush.msra.mxu1 %v2007_v27  ;;  %889 = vmatpush.msra.mxu0 %v2092_v52 }
  0x85   : > { %1026 = vmatpush.msra.mxu3 %v1998_v15  ;;  %975 = vmatpush.msra.mxu2 %v788_v9 }
  0x86   : > { %928 = vmatpush.msra.mxu1 %v2009_v62  ;;  %892 = vmatpush.msra.mxu0 %v2099_v50 }
  0x87   : > { %1028 = vmatpush.msra.mxu3 %v2000_v23  ;;  %979 = vmatpush.msra.mxu2 %v794_v47 }
  0x88   : > { %930 = vmatpush.msra.mxu1 %v2023_v12  ;;  %895 = vmatpush.msra.mxu0 %v2112_v48 }
  0x89   : > { %1030 = vmatpush.msra.mxu3 %v2002_v16  ;;  %983 = vmatpush.msra.mxu2 %v800_v10 }
  0x8a   : > { %932 = vmatpush.msra.mxu1 %v2038_v32  ;;  %898 = vmatpush.msra.mxu0 %v2125_v22 }
  0x8b   : > { %1032 = vmatpush.msra.mxu3 %v2005_v19  ;;  %987 = vmatpush.msra.mxu2 %v806_v11 }
  0x8c   : > { %934 = vmatpush.msra.mxu1 %v2077_v46  ;;  %901 = vmatpush.msra.mxu0 %v2138_v60 }
  0x8d   : > { %1034 = vmatpush.msra.mxu3 %v2007_v27  ;;  %991 = vmatpush.msra.mxu2 %v812_v56 }
  0x8e   : > { %936 = vmatpush.msra.mxu1 %v2079_v57  ;;  %904 = vmatpush.msra.mxu0 %v2151_v0 }
  0x8f   : > { %1036 = vmatpush.msra.mxu3 %v2009_v62  ;;  %995 = vmatpush.msra.mxu2 %v818_v3 }
  0x90   : > { %938 = vmatpush.msra.mxu1 %v2085_v5  ;;  %907 = vmatpush.msra.mxu0 %v2164_v13 }
  0x91   : > { %1038 = vmatpush.msra.mxu3 %v2023_v12  ;;  %999 = vmatpush.msra.mxu2 %v824_v29 }
  0x92   : > { %940 = vmatpush.msra.mxu1 %v2101_v17  ;;  %910 = vmatpush.msra.mxu0 %v2174_v40 }
  0x93   : > { %1040 = vmatpush.msra.mxu3 %v2038_v32  ;;  %1003 = vmatpush.msra.mxu2 %v830_v53 }
  0x94   : > { %942 = vmatpush.msra.mxu1 %v2114_v24 }
  0x95   : > { %1042 = vmatpush.msra.mxu3 %v2077_v46  ;;  %1007 = vmatpush.msra.mxu2 %v836_v61 }
  0x96   : > { %944 = vmatpush.msra.mxu1 %v2127_v20 }
  0x97   : > { %1044 = vmatpush.msra.mxu3 %v2079_v57  ;;  %1011 = vmatpush.msra.mxu2 %v842_v7 }
  0x98   : > { %946 = vmatpush.msra.mxu1 %v2140_v49 }
  0x99   : > { %1046 = vmatpush.msra.mxu3 %v2085_v5  ;;  %1015 = vmatpush.msra.mxu2 %v848_v2 }
  0x9a   : > { %948 = vmatpush.msra.mxu1 %v2153_v58 }
  0x9b   : > { %1048 = vmatpush.msra.mxu3 %v2101_v17  ;;  %1019 = vmatpush.msra.mxu2 %v854_v28 }
  0x9d   : > { %1050 = vmatpush.msra.mxu3 %v2114_v24 }
  0x9f   : > { %1052 = vmatpush.msra.mxu3 %v2127_v20 }
  0xa1   : > { %1054 = vmatpush.msra.mxu3 %v2140_v49 }
  0xa3   : > { %1056 = vmatpush.msra.mxu3 %v2153_v58 }
  0xd4   : > { %v402_v23 = vpop.f32.mrf.mxu0 }
  0xd8   : > { %v503_v15 = vpop.f32.mrf.mxu1  ;;  %v596_v62 = vpop.f32.mrf.mxu3 }
  0xd9   : > { %v504_v16 = vadd.f32 %v503_v15, %v402_v23 }
  0xda   : > { %v557_v19 = vpop.f32.mrf.mxu2 }
  0xdb   : > { %v558_v27 = vadd.f32 %v557_v19, %v504_v16 }
  0xdd   : > { %v597_v33 = vadd.f32 %v596_v62, %v558_v27 }
  0xf0   : > { %v665_v63 = vpop.f32.mrf.mxu0 }
  0xf1   : > { %v666_v6 = vadd.f32 %v665_v63, %v597_v33 }
  0xf8   : > { %v702_v12 = vpop.f32.mrf.mxu1 }
  0xf9   : > { %v703_v26 = vadd.f32 %v702_v12, %v666_v6 }
  0xfb   : > { %v753_v4 = vand.u32 4294901760, %v703_v26  ;;  %1062 = vst [vmem:[%s341_s1] sm:$0xff] %v703_v26 }
  0xfd   : > { %v754_v21 = vsub.f32 %v703_v26, %v753_v4  ;;  %859 = vmatmul.f32.vlgmr.msrb.gmra.mxu3 %v753_v4 }
  0xff   : > { %913 = vmatmul.f32.vlgmr.msra.gmra.mxu0 %v754_v21  ;;  %v755_v34 = vand.u32 4294901760, %v754_v21 }
 0x101   : > { %952 = vmatmul.f32.vlgmr.msra.gmra.mxu1 %v755_v34  ;;  %v756_v30 = vsub.f32 %v754_v21, %v755_v34 }
 0x103   : > { %v757_v32 = vand.u32 4294901760, %v756_v30 }
 0x105   : > { %758 = vmatmul.f32.vlgmr.msrb.gmra.mxu2 %v757_v32  ;;  %1058 = vmatmul.f32.vlgmr.msra.gmra.mxu3 %v753_v4 }
 0x10d   : > { %1021 = vmatmul.f32.vlgmr.msra.gmra.mxu2 %v753_v4 }
 0x10e   : > { %1519 = shalt.err (!%p1516_p0)
}
 0x10f   : > { %1286 = dma.vmem_to_hbm [thread:$0]  (%p1740_p3), %s1099_s14, 128, %s1101_s24, %s1070_s25  }
 0x110   : > { %s1081_s8 = scalar_lea.hbm %s2337_s4, %s1267_s26  ;;  %s334_s13 = scalar_lea.vmem [#allocation10], %s1771_s15 }
 0x111   : > { %s1083_s30 = sshll.u32 %s334_s13, 4  ;;  %s1085_s6 = sshll.u32 %s1081_s8, 4  ;;  %s1084_s30 = int_to_ptr.vmem [resolvable:$true] %s1083_s30  ;;  %s1086_s6 = int_to_ptr.hbm [resolvable:$true] %s1085_s6 }
 0x112   : > { %s1065_s14 = scalar_lea.sflag [#allocation4], %s1768_s7  ;;  %s1534_s24 = sshra.s32 %s1086_s6, 4  ;;  %s1535_s24 = int_to_ptr.hbm [resolvable:$true] %s1534_s24 }
 0x113   : > { %s1536_s25 = scalar_lea.hbm %s1535_s24, 8  ;;  %s1540_s15 = scalar_lea.hbm %s2337_s4, 16 }
 0x114   : > { %p1537_p5 = scmp.ne.s32.totalorder %s1535_s24, %s1536_s25  ;;  %p1541_p2 = scmp.lt.s32.totalorder %s1535_s24, %s2337_s4 }
 0x115   : > { %p1542_p1 = scmp.lt.s32.totalorder %s1540_s15, %s1536_s25 }
 0x116   : > { %p1538_p7 = pnand %p1537_p5, %p1740_p3 }
 0x117   : > { %p1543_p4 = por %p1542_p1, %p1541_p2 }
 0x118   : > { %p1539_p10 = pneg %p1538_p7 }
 0x11a   : > { %p1544_p8 = pnand %p1543_p4, %p1539_p10 }
 0x17c   : > { %v914_v14 = vpop.f32.mrf.mxu0 }
 0x17e   : > { %v953_v10 = vpop.f32.mrf.mxu1 }
 0x180   : > { %v860_v42 = vpop.f32.mrf.mxu3 }
 0x188   : > { %v759_v43 = vpop.f32.mrf.mxu2  ;;  %v1059_v11 = vpop.f32.mrf.mxu3 }
 0x189   : > { %v760_v41 = vadd.f32 %v1894_v59, %v759_v43 }
 0x18b   : > { %v861_v9 = vadd.f32 %v860_v42, %v760_v41 }
 0x18d   : > { %v915_v47 = vadd.f32 %v914_v14, %v861_v9 }
 0x18f   : > { %v954_v46 = vadd.f32 %v953_v10, %v915_v47 }
 0x190   : > { %v1022_v57 = vpop.f32.mrf.mxu2 }
 0x191   : > { %v1023_v5 = vadd.f32 %v1022_v57, %v954_v46 }
 0x193   : > { %v1060_v52 = vadd.f32 %v1059_v11, %v1023_v5 }
 0x195   : > { %1063 = vst [vmem:[%s334_s13] sm:$0xff] %v1060_v52 }
 0x196   : > { %1547 = shalt.err (!%p1544_p8)
}
 0x197   : > { %1285 = dma.vmem_to_hbm [thread:$0]  (%p1740_p3), %s1084_s30, 128, %s1086_s6, %s1065_s14  }
 0x198 PF: > { %s1112_s7 = sand.u32 1, %s1594_s18   ;;  %p1304_p11 = pnand %p1255_p9, %p1700_p6 }
 0x199   : > { %s1113_s16 = scalar_lea.sflag [#allocation4], %s1112_s7 }
 0x19a   : > { %p1305_p12 = pneg %p1304_p11 }
 0x19c   : > { %1585 = dma.done.wait (%p1305_p12), %s1113_s16, 128  }
 0x19d   : > { %1587 = vsyncadd (%p1305_p12), %s1113_s16, 4294967168  ;;  %s1123_s17 = scalar_lea.sflag [#allocation12], %s1112_s7 }
 0x19e   : > { %1589 = dma.done.wait (%p1305_p12), %s1123_s17, 128  }
 0x19f   : > { %1591 = vsyncadd (%p1305_p12), %s1123_s17, 4294967168  ;;  %s27_s23 = sadd.s32 1, %s1614_s23   ;;  %s2349_s18 = smov %s1598_s19 }
 0x1a0   : > { %p24_p13 = scmp.ge.s32.totalorder %s27_s23, 4   ;;  %s2350_s19 = smov %s1602_s20 }
 0x1a1   : > { %s2351_s20 = smov %s1756_s27  ;;  %s2352_s21 = smov %s1610_s22 }
 0x1a2   : > { %s2353_s22 = smov %s2355_s10  ;;  %26 = sbr.rel (!%p24_p13) target bundleno = 12 (0xc), region = 113 }
 0x1a7   :  { %1129 = vsyncpa [#allocation3], 1 }
 0x1a8   :  { %1131 = vsyncpa [#allocation3 + $0x1], 1 }
 0x1a9   :  { %1132 = vsyncpa [#allocation6], 1 }
 0x1aa   :  { %1133 = vsyncpa [#allocation9], 1 }
 0x1ab   :  { %1134 = vsyncpa [#allocation4], 1 }
 0x1ac   :  { %1136 = vsyncpa [#allocation4 + $0x1], 1 }
 0x1ad   :  { %1137 = vsyncpa [#allocation12], 1 }
 0x1ae   :  { %1139 = vsyncpa [#allocation12 + $0x1], 1 }

</bundles_post_ra>
